<compile_context>
chip_gen: v7x
topology: tpu7x:2x2x1
jax: 0.10.0
libtpu: 0.0.40
codegen_flags: <defaults>
</compile_context>

<pallas_src>
import math
import jax
import jax.numpy as jnp
from jax.experimental import pallas as pl
from jax.experimental.pallas import tpu as pltpu

# ---------------------------------------------------------------------------
# Model hyper-parameters (small, synthetic)
# ---------------------------------------------------------------------------
B = 2      # batch
S = 8      # sequence length
H = 32     # hidden size
NH = 4     # attention heads
HD = H // NH
FF = 64    # feed-forward inner dim
EPS = 1e-5

LANES = 128
ROWS_PER_BLOCK = LANES // H            # 4 output rows packed per dense lane row
N_BLOCKS = (B * S) // ROWS_PER_BLOCK   # 4 dense lane-rows
N_VEC_ROWS = 8                         # packed parameter rows


def _gelu_tanh(x):
    # tanh-approximation GELU (EUP-friendly on TPU).
    # TODO(synk): swap for exact erf-GELU / ReLU to match a specific injected encoder.
    c = math.sqrt(2.0 / math.pi)
    return 0.5 * x * (1.0 + jnp.tanh(c * (x + 0.044715 * x * x * x)))


def _layernorm(x, gamma, beta):
    # Single-pass stats: mean and mean-of-squares computed together so the two
    # cross-lane reductions are independent (var = E[x^2] - E[x]^2).
    mean = jnp.mean(x, axis=-1, keepdims=True)
    msq = jnp.mean(x * x, axis=-1, keepdims=True)
    var = msq - mean * mean
    inv = jax.lax.rsqrt(var + EPS)
    return (x - mean) * inv * gamma + beta


def _mxu_dot(a, b):
    # bf16 operands, f32 accumulation (MXU-native on all TPU generations here).
    return jnp.dot(a.astype(jnp.bfloat16), b.astype(jnp.bfloat16),
                   preferred_element_type=jnp.float32)


def encoder_kernel(x_ref, wqkv_ref, wo_ref, w1_ref, w2_ref, vec_ref, o_ref):
    x = x_ref[...].astype(jnp.float32)                      # (B*S, H)

    # ---- unpack sublane-packed params (whole-row selects, lanes start at 0) --
    vec = vec_ref[...]                                      # (8, 128)
    bqkv = vec[0:1, 0:3 * H]                                # (1, 3H)
    bo   = vec[1:2, 0:H]
    g1   = vec[2:3, 0:H]
    be1  = vec[3:4, 0:H]
    bf1  = vec[4:5, 0:FF]
    bf2  = vec[5:6, 0:H]
    g2   = vec[6:7, 0:H]
    be2  = vec[7:8, 0:H]

    # ---- fused QKV projection (1/sqrt(HD) already folded into Q columns) ----
    qkv = _mxu_dot(x, wqkv_ref[...]) + bqkv                 # (B*S, 3H)

    # ---- batched multi-head self-attention over (B*NH) head-instances -------
    def split_heads(t2d):                                   # (B*S, H) -> (NH*B, S, HD)
        t3 = t2d.reshape(B, S, H)
        return jnp.concatenate(
            [t3[:, :, h * HD:(h + 1) * HD] for h in range(NH)], axis=0)

    qh = split_heads(qkv[:, 0:H])
    kh = split_heads(qkv[:, H:2 * H])
    vh = split_heads(qkv[:, 2 * H:3 * H])

    scores = jnp.einsum('bqd,bkd->bqk', qh, kh,
                        preferred_element_type=jnp.float32)  # (NH*B, S, S)
    scores = scores - jnp.max(scores, axis=-1, keepdims=True)
    p = jnp.exp(scores)
    p = p * pl.reciprocal(jnp.sum(p, axis=-1, keepdims=True), approx=True)
    ctx = jnp.einsum('bqk,bkd->bqd', p, vh,
                     preferred_element_type=jnp.float32)     # (NH*B, S, HD)

    # merge heads back into lanes — stays in registers, no VMEM round trip
    ctx2d = jnp.concatenate(
        [ctx[h * B:(h + 1) * B] for h in range(NH)], axis=-1).reshape(B * S, H)

    # ---- output projection + residual + LayerNorm 1 --------------------------
    attn = _mxu_dot(ctx2d, wo_ref[...]) + bo
    x1 = _layernorm(x + attn, g1, be1)

    # ---- feed-forward + residual + LayerNorm 2 --------------------------------
    hdn = _gelu_tanh(_mxu_dot(x1, w1_ref[...]) + bf1)
    ff = _mxu_dot(hdn, w2_ref[...]) + bf2
    out = _layernorm(x1 + ff, g2, be2)                       # (B*S, H)

    # ---- lane-dense store: pack ROWS_PER_BLOCK row-blocks into 128 lanes ------
    o_ref[...] = jnp.concatenate(
        [out[r * ROWS_PER_BLOCK:(r + 1) * ROWS_PER_BLOCK, :]
         for r in range(N_BLOCKS)], axis=-1).astype(o_ref.dtype)   # (4, 128)


def make_params(key):
    """Deterministic synthetic transformer-encoder-layer parameters."""
    ks = jax.random.split(key, 6)
    std = 0.02
    scale = 1.0 / math.sqrt(HD)
    # Attention scale is folded into the Q projection (weights AND bias).
    wq = jax.random.normal(ks[0], (H, H), jnp.float32) * std * scale
    wk = jax.random.normal(ks[1], (H, H), jnp.float32) * std
    wv = jax.random.normal(ks[2], (H, H), jnp.float32) * std
    wo = jax.random.normal(ks[3], (H, H), jnp.float32) * std
    w1 = jax.random.normal(ks[4], (H, FF), jnp.float32) * std
    w2 = jax.random.normal(ks[5], (FF, H), jnp.float32) * std
    wqkv = jnp.concatenate([wq, wk, wv], axis=1)             # (H, 3H)

    bq = jnp.zeros((H,), jnp.float32) * scale
    bk = jnp.zeros((H,), jnp.float32)
    bv = jnp.zeros((H,), jnp.float32)
    bqkv = jnp.concatenate([bq, bk, bv])                     # (3H,)
    bo  = jnp.zeros((H,), jnp.float32)
    g1  = jnp.ones((H,), jnp.float32)
    be1 = jnp.zeros((H,), jnp.float32)
    bf1 = jnp.zeros((FF,), jnp.float32)
    bf2 = jnp.zeros((H,), jnp.float32)
    g2  = jnp.ones((H,), jnp.float32)
    be2 = jnp.zeros((H,), jnp.float32)

    def row(v):
        v = v.reshape(1, -1)
        return jnp.pad(v, ((0, 0), (0, LANES - v.shape[1])))

    # Sublane-packed parameters: one vector per row, lane-padded to 128.
    vec = jnp.concatenate(
        [row(bqkv), row(bo), row(g1), row(be1),
         row(bf1), row(bf2), row(g2), row(be2)], axis=0)
    assert vec.shape == (N_VEC_ROWS, LANES)

    return {"wqkv": wqkv, "wo": wo, "w1": w1, "w2": w2, "vec": vec}


def encoder_forward(x, params):
    """Equivalent of Encoder.forward(input): output = self.encoder(input)."""
    B_, S_, H_ = x.shape
    x2d = x.reshape(B_ * S_, H_)            # fold batch into sublanes

    vmem = lambda: pl.BlockSpec(memory_space=pltpu.MemorySpace.VMEM)

    out_dense = pl.pallas_call(
        encoder_kernel,
        out_shape=jax.ShapeDtypeStruct((ROWS_PER_BLOCK, N_BLOCKS * H), jnp.float32),
        in_specs=[vmem() for _ in range(6)],
        out_specs=vmem(),
    )(x2d, params["wqkv"], params["wo"], params["w1"], params["w2"], params["vec"])

    # Undo the lane-dense packing on the host side (cheap XLA reshuffle).
    out2d = (out_dense.reshape(ROWS_PER_BLOCK, N_BLOCKS, H)
             .transpose(1, 0, 2).reshape(B_ * S_, H_))
    return out2d.reshape(B_, S_, H_)


def encoder_reference(x, params):
    """Pure-JAX reference (f32 everywhere) for a sanity check."""
    xs = x.reshape(B * S, H).astype(jnp.float32)
    vec = params["vec"]
    bqkv, bo = vec[0, 0:3 * H], vec[1, 0:H]
    g1, be1 = vec[2, 0:H], vec[3, 0:H]
    bf1, bf2 = vec[4, 0:FF], vec[5, 0:H]
    g2, be2 = vec[6, 0:H], vec[7, 0:H]

    qkv = xs @ params["wqkv"] + bqkv
    q, k, v = qkv[:, :H], qkv[:, H:2 * H], qkv[:, 2 * H:]
    rows_out = []
    for b in range(B):
        r = slice(b * S, (b + 1) * S)
        heads = []
        for h in range(NH):
            c = slice(h * HD, (h + 1) * HD)
            s_ = q[r, c] @ k[r, c].T          # scale already folded into wq
            p_ = jax.nn.softmax(s_, axis=-1)
            heads.append(p_ @ v[r, c])
        rows_out.append(jnp.concatenate(heads, axis=-1))
    ctx = jnp.concatenate(rows_out, axis=0)

    def ln(t, g, bta):
        m = jnp.mean(t, -1, keepdims=True)
        vv = jnp.var(t, -1, keepdims=True)
        return (t - m) * jax.lax.rsqrt(vv + EPS) * g + bta

    attn = ctx @ params["wo"] + bo
    x1 = ln(xs + attn, g1, be1)
    hdn = _gelu_tanh(x1 @ params["w1"] + bf1)
    ff = hdn @ params["w2"] + bf2
    return ln(x1 + ff, g2, be2).reshape(B, S, H)


if __name__ == "__main__":
    key = jax.random.PRNGKey(0)
    kx, kp = jax.random.split(key)
    x = jax.random.normal(kx, (B, S, H), jnp.float32)
    params = make_params(kp)

    y = encoder_forward(x, params)
    jax.block_until_ready(y)

    assert y.shape == (B, S, H) and y.dtype == jnp.float32
    assert bool(jnp.all(jnp.isfinite(y)))

    # Loose tolerance: kernel uses bf16 MXU operands + approx reciprocal.
    y_ref = encoder_reference(x, params)
    assert bool(jnp.allclose(y, y_ref, atol=3e-2, rtol=3e-2))

    print("KERNEL_OK")
</pallas_src>

<mosaic_0001>
module attributes {stable_mosaic.version = 11 : i64} {
  func.func @encoder_kernel(%arg0: memref<16x32xf32, #tpu.memory_space<vmem>>, %arg1: memref<32x96xf32, #tpu.memory_space<vmem>>, %arg2: memref<32x32xf32, #tpu.memory_space<vmem>>, %arg3: memref<32x64xf32, #tpu.memory_space<vmem>>, %arg4: memref<64x32xf32, #tpu.memory_space<vmem>>, %arg5: memref<8x128xf32, #tpu.memory_space<vmem>>, %arg6: memref<4x128xf32, #tpu.memory_space<vmem>>) attributes {dimension_semantics = [], scalar_prefetch = 0 : i64, scratch_operands = 0 : i64, tpu.core_type = #tpu.core_type<tc>} {
    %c0 = arith.constant 0 : index
    %c0_0 = arith.constant 0 : index
    %0 = vector.load %arg0[%c0, %c0_0] : memref<16x32xf32, #tpu.memory_space<vmem>>, vector<16x32xf32>
    %c0_1 = arith.constant 0 : index
    %c0_2 = arith.constant 0 : index
    %1 = vector.load %arg5[%c0_1, %c0_2] : memref<8x128xf32, #tpu.memory_space<vmem>>, vector<8x128xf32>
    %2 = vector.extract_strided_slice %1 {offsets = [0, 0], sizes = [1, 96], strides = [1, 1]} : vector<8x128xf32> to vector<1x96xf32>
    %3 = vector.extract_strided_slice %1 {offsets = [1, 0], sizes = [1, 32], strides = [1, 1]} : vector<8x128xf32> to vector<1x32xf32>
    %4 = vector.extract_strided_slice %1 {offsets = [2, 0], sizes = [1, 32], strides = [1, 1]} : vector<8x128xf32> to vector<1x32xf32>
    %5 = vector.extract_strided_slice %1 {offsets = [3, 0], sizes = [1, 32], strides = [1, 1]} : vector<8x128xf32> to vector<1x32xf32>
    %6 = vector.extract_strided_slice %1 {offsets = [4, 0], sizes = [1, 64], strides = [1, 1]} : vector<8x128xf32> to vector<1x64xf32>
    %7 = vector.extract_strided_slice %1 {offsets = [5, 0], sizes = [1, 32], strides = [1, 1]} : vector<8x128xf32> to vector<1x32xf32>
    %8 = vector.extract_strided_slice %1 {offsets = [6, 0], sizes = [1, 32], strides = [1, 1]} : vector<8x128xf32> to vector<1x32xf32>
    %9 = vector.extract_strided_slice %1 {offsets = [7, 0], sizes = [1, 32], strides = [1, 1]} : vector<8x128xf32> to vector<1x32xf32>
    %c0_3 = arith.constant 0 : index
    %c0_4 = arith.constant 0 : index
    %10 = vector.load %arg1[%c0_3, %c0_4] : memref<32x96xf32, #tpu.memory_space<vmem>>, vector<32x96xf32>
    %11 = arith.truncf %0 : vector<16x32xf32> to vector<16x32xbf16>
    %12 = arith.truncf %10 : vector<32x96xf32> to vector<32x96xbf16>
    %cst = arith.constant dense<0.000000e+00> : vector<16x96xf32>
    %13 = tpu.matmul %11, %12, %cst {dimension_numbers = #tpu.dot_dimension_numbers<[1], [0], [0], [1], [0, 0, 1, 1], [], []>} : vector<16x32xbf16>, vector<32x96xbf16>, vector<16x96xf32> -> vector<16x96xf32>
    %14 = vector.broadcast %2 : vector<1x96xf32> to vector<16x96xf32>
    %15 = arith.addf %13, %14 : vector<16x96xf32>
    %16 = vector.extract_strided_slice %15 {offsets = [0, 0], sizes = [16, 32], strides = [1, 1]} : vector<16x96xf32> to vector<16x32xf32>
    %17 = vector.shape_cast %16 : vector<16x32xf32> to vector<2x8x32xf32>
    %18 = vector.extract_strided_slice %17 {offsets = [0, 0, 0], sizes = [2, 8, 8], strides = [1, 1, 1]} : vector<2x8x32xf32> to vector<2x8x8xf32>
    %19 = vector.extract_strided_slice %17 {offsets = [0, 0, 8], sizes = [2, 8, 8], strides = [1, 1, 1]} : vector<2x8x32xf32> to vector<2x8x8xf32>
    %20 = vector.extract_strided_slice %17 {offsets = [0, 0, 16], sizes = [2, 8, 8], strides = [1, 1, 1]} : vector<2x8x32xf32> to vector<2x8x8xf32>
    %21 = vector.extract_strided_slice %17 {offsets = [0, 0, 24], sizes = [2, 8, 8], strides = [1, 1, 1]} : vector<2x8x32xf32> to vector<2x8x8xf32>
    %22 = tpu.concatenate %18, %19, %20, %21 in 0 : vector<2x8x8xf32>, vector<2x8x8xf32>, vector<2x8x8xf32>, vector<2x8x8xf32> -> vector<8x8x8xf32>
    %23 = vector.extract_strided_slice %15 {offsets = [0, 32], sizes = [16, 32], strides = [1, 1]} : vector<16x96xf32> to vector<16x32xf32>
    %24 = vector.shape_cast %23 : vector<16x32xf32> to vector<2x8x32xf32>
    %25 = vector.extract_strided_slice %24 {offsets = [0, 0, 0], sizes = [2, 8, 8], strides = [1, 1, 1]} : vector<2x8x32xf32> to vector<2x8x8xf32>
    %26 = vector.extract_strided_slice %24 {offsets = [0, 0, 8], sizes = [2, 8, 8], strides = [1, 1, 1]} : vector<2x8x32xf32> to vector<2x8x8xf32>
    %27 = vector.extract_strided_slice %24 {offsets = [0, 0, 16], sizes = [2, 8, 8], strides = [1, 1, 1]} : vector<2x8x32xf32> to vector<2x8x8xf32>
    %28 = vector.extract_strided_slice %24 {offsets = [0, 0, 24], sizes = [2, 8, 8], strides = [1, 1, 1]} : vector<2x8x32xf32> to vector<2x8x8xf32>
    %29 = tpu.concatenate %25, %26, %27, %28 in 0 : vector<2x8x8xf32>, vector<2x8x8xf32>, vector<2x8x8xf32>, vector<2x8x8xf32> -> vector<8x8x8xf32>
    %30 = vector.extract_strided_slice %15 {offsets = [0, 64], sizes = [16, 32], strides = [1, 1]} : vector<16x96xf32> to vector<16x32xf32>
    %31 = vector.shape_cast %30 : vector<16x32xf32> to vector<2x8x32xf32>
    %32 = vector.extract_strided_slice %31 {offsets = [0, 0, 0], sizes = [2, 8, 8], strides = [1, 1, 1]} : vector<2x8x32xf32> to vector<2x8x8xf32>
    %33 = vector.extract_strided_slice %31 {offsets = [0, 0, 8], sizes = [2, 8, 8], strides = [1, 1, 1]} : vector<2x8x32xf32> to vector<2x8x8xf32>
    %34 = vector.extract_strided_slice %31 {offsets = [0, 0, 16], sizes = [2, 8, 8], strides = [1, 1, 1]} : vector<2x8x32xf32> to vector<2x8x8xf32>
    %35 = vector.extract_strided_slice %31 {offsets = [0, 0, 24], sizes = [2, 8, 8], strides = [1, 1, 1]} : vector<2x8x32xf32> to vector<2x8x8xf32>
    %36 = tpu.concatenate %32, %33, %34, %35 in 0 : vector<2x8x8xf32>, vector<2x8x8xf32>, vector<2x8x8xf32>, vector<2x8x8xf32> -> vector<8x8x8xf32>
    "tpu.trace_start"() <{level = 10 : i32, message = "bqd,bkd->bqk"}> : () -> ()
    %cst_5 = arith.constant dense<0.000000e+00> : vector<8x8x8xf32>
    %37 = tpu.matmul %22, %29, %cst_5 {dimension_numbers = #tpu.dot_dimension_numbers<[2], [2], [1], [1], [0, 0, 0, 1, 1, 1], [0], [0]>} : vector<8x8x8xf32>, vector<8x8x8xf32>, vector<8x8x8xf32> -> vector<8x8x8xf32>
    "tpu.trace_stop"() : () -> ()
    %cst_6 = arith.constant dense<0xFF800000> : vector<8x8xf32>
    %38 = vector.multi_reduction <maximumf>, %37, %cst_6 [2] : vector<8x8x8xf32> to vector<8x8xf32>
    %39 = vector.shape_cast %38 : vector<8x8xf32> to vector<8x8x1xf32>
    %40 = vector.broadcast %39 : vector<8x8x1xf32> to vector<8x8x8xf32>
    %41 = arith.subf %37, %40 : vector<8x8x8xf32>
    %42 = math.exp %41 : vector<8x8x8xf32>
    %cst_7 = arith.constant dense<0.000000e+00> : vector<8x8xf32>
    %43 = vector.multi_reduction <add>, %42, %cst_7 [2] : vector<8x8x8xf32> to vector<8x8xf32>
    %44 = vector.shape_cast %43 : vector<8x8xf32> to vector<8x8x1xf32>
    %45 = tpu.reciprocal %44 {approx = true} : vector<8x8x1xf32> -> vector<8x8x1xf32>
    %46 = vector.broadcast %45 : vector<8x8x1xf32> to vector<8x8x8xf32>
    %47 = arith.mulf %42, %46 : vector<8x8x8xf32>
    "tpu.trace_start"() <{level = 10 : i32, message = "bqk,bkd->bqd"}> : () -> ()
    %cst_8 = arith.constant dense<0.000000e+00> : vector<8x8x8xf32>
    %48 = tpu.matmul %47, %36, %cst_8 {dimension_numbers = #tpu.dot_dimension_numbers<[2], [1], [1], [2], [0, 0, 0, 1, 1, 2], [0], [0]>} : vector<8x8x8xf32>, vector<8x8x8xf32>, vector<8x8x8xf32> -> vector<8x8x8xf32>
    "tpu.trace_stop"() : () -> ()
    %49 = vector.extract_strided_slice %48 {offsets = [0, 0, 0], sizes = [2, 8, 8], strides = [1, 1, 1]} : vector<8x8x8xf32> to vector<2x8x8xf32>
    %50 = vector.extract_strided_slice %48 {offsets = [2, 0, 0], sizes = [2, 8, 8], strides = [1, 1, 1]} : vector<8x8x8xf32> to vector<2x8x8xf32>
    %51 = vector.extract_strided_slice %48 {offsets = [4, 0, 0], sizes = [2, 8, 8], strides = [1, 1, 1]} : vector<8x8x8xf32> to vector<2x8x8xf32>
    %52 = vector.extract_strided_slice %48 {offsets = [6, 0, 0], sizes = [2, 8, 8], strides = [1, 1, 1]} : vector<8x8x8xf32> to vector<2x8x8xf32>
    %53 = tpu.concatenate %49, %50, %51, %52 in 2 : vector<2x8x8xf32>, vector<2x8x8xf32>, vector<2x8x8xf32>, vector<2x8x8xf32> -> vector<2x8x32xf32>
    %54 = vector.shape_cast %53 : vector<2x8x32xf32> to vector<16x32xf32>
    %c0_9 = arith.constant 0 : index
    %c0_10 = arith.constant 0 : index
    %55 = vector.load %arg2[%c0_9, %c0_10] : memref<32x32xf32, #tpu.memory_space<vmem>>, vector<32x32xf32>
    %56 = arith.truncf %54 : vector<16x32xf32> to vector<16x32xbf16>
    %57 = arith.truncf %55 : vector<32x32xf32> to vector<32x32xbf16>
    %cst_11 = arith.constant dense<0.000000e+00> : vector<16x32xf32>
    %58 = tpu.matmul %56, %57, %cst_11 {dimension_numbers = #tpu.dot_dimension_numbers<[1], [0], [0], [1], [0, 0, 1, 1], [], []>} : vector<16x32xbf16>, vector<32x32xbf16>, vector<16x32xf32> -> vector<16x32xf32>
    %59 = vector.broadcast %3 : vector<1x32xf32> to vector<16x32xf32>
    %60 = arith.addf %58, %59 : vector<16x32xf32>
    %61 = arith.addf %0, %60 : vector<16x32xf32>
    %cst_12 = arith.constant dense<0.000000e+00> : vector<16xf32>
    %62 = vector.multi_reduction <add>, %61, %cst_12 [1] : vector<16x32xf32> to vector<16xf32>
    %63 = vector.shape_cast %62 : vector<16xf32> to vector<16x1xf32>
    %cst_13 = arith.constant 3.200000e+01 : f32
    %64 = vector.broadcast %cst_13 : f32 to vector<16x1xf32>
    %65 = arith.divf %63, %64 : vector<16x1xf32>
    %66 = arith.mulf %61, %61 : vector<16x32xf32>
    %cst_14 = arith.constant dense<0.000000e+00> : vector<16xf32>
    %67 = vector.multi_reduction <add>, %66, %cst_14 [1] : vector<16x32xf32> to vector<16xf32>
    %68 = vector.shape_cast %67 : vector<16xf32> to vector<16x1xf32>
    %cst_15 = arith.constant 3.200000e+01 : f32
    %69 = vector.broadcast %cst_15 : f32 to vector<16x1xf32>
    %70 = arith.divf %68, %69 : vector<16x1xf32>
    %71 = arith.mulf %65, %65 : vector<16x1xf32>
    %72 = arith.subf %70, %71 : vector<16x1xf32>
    %cst_16 = arith.constant 9.99999974E-6 : f32
    %73 = vector.broadcast %cst_16 : f32 to vector<16x1xf32>
    %74 = arith.addf %72, %73 : vector<16x1xf32>
    %75 = math.rsqrt %74 : vector<16x1xf32>
    %76 = vector.broadcast %65 : vector<16x1xf32> to vector<16x32xf32>
    %77 = arith.subf %61, %76 : vector<16x32xf32>
    %78 = vector.broadcast %75 : vector<16x1xf32> to vector<16x32xf32>
    %79 = arith.mulf %77, %78 : vector<16x32xf32>
    %80 = vector.broadcast %4 : vector<1x32xf32> to vector<16x32xf32>
    %81 = arith.mulf %79, %80 : vector<16x32xf32>
    %82 = vector.broadcast %5 : vector<1x32xf32> to vector<16x32xf32>
    %83 = arith.addf %81, %82 : vector<16x32xf32>
    %c0_17 = arith.constant 0 : index
    %c0_18 = arith.constant 0 : index
    %84 = vector.load %arg3[%c0_17, %c0_18] : memref<32x64xf32, #tpu.memory_space<vmem>>, vector<32x64xf32>
    %85 = arith.truncf %83 : vector<16x32xf32> to vector<16x32xbf16>
    %86 = arith.truncf %84 : vector<32x64xf32> to vector<32x64xbf16>
    %cst_19 = arith.constant dense<0.000000e+00> : vector<16x64xf32>
    %87 = tpu.matmul %85, %86, %cst_19 {dimension_numbers = #tpu.dot_dimension_numbers<[1], [0], [0], [1], [0, 0, 1, 1], [], []>} : vector<16x32xbf16>, vector<32x64xbf16>, vector<16x64xf32> -> vector<16x64xf32>
    %88 = vector.broadcast %6 : vector<1x64xf32> to vector<16x64xf32>
    %89 = arith.addf %87, %88 : vector<16x64xf32>
    %cst_20 = arith.constant 5.000000e-01 : f32
    %90 = vector.broadcast %cst_20 : f32 to vector<16x64xf32>
    %91 = arith.mulf %90, %89 : vector<16x64xf32>
    %cst_21 = arith.constant 4.471500e-02 : f32
    %92 = vector.broadcast %cst_21 : f32 to vector<16x64xf32>
    %93 = arith.mulf %92, %89 : vector<16x64xf32>
    %94 = arith.mulf %93, %89 : vector<16x64xf32>
    %95 = arith.mulf %94, %89 : vector<16x64xf32>
    %96 = arith.addf %89, %95 : vector<16x64xf32>
    %cst_22 = arith.constant 0.797884583 : f32
    %97 = vector.broadcast %cst_22 : f32 to vector<16x64xf32>
    %98 = arith.mulf %97, %96 : vector<16x64xf32>
    %99 = math.tanh %98 : vector<16x64xf32>
    %cst_23 = arith.constant 1.000000e+00 : f32
    %100 = vector.broadcast %cst_23 : f32 to vector<16x64xf32>
    %101 = arith.addf %100, %99 : vector<16x64xf32>
    %102 = arith.mulf %91, %101 : vector<16x64xf32>
    %c0_24 = arith.constant 0 : index
    %c0_25 = arith.constant 0 : index
    %103 = vector.load %arg4[%c0_24, %c0_25] : memref<64x32xf32, #tpu.memory_space<vmem>>, vector<64x32xf32>
    %104 = arith.truncf %102 : vector<16x64xf32> to vector<16x64xbf16>
    %105 = arith.truncf %103 : vector<64x32xf32> to vector<64x32xbf16>
    %cst_26 = arith.constant dense<0.000000e+00> : vector<16x32xf32>
    %106 = tpu.matmul %104, %105, %cst_26 {dimension_numbers = #tpu.dot_dimension_numbers<[1], [0], [0], [1], [0, 0, 1, 1], [], []>} : vector<16x64xbf16>, vector<64x32xbf16>, vector<16x32xf32> -> vector<16x32xf32>
    %107 = vector.broadcast %7 : vector<1x32xf32> to vector<16x32xf32>
    %108 = arith.addf %106, %107 : vector<16x32xf32>
    %109 = arith.addf %83, %108 : vector<16x32xf32>
    %cst_27 = arith.constant dense<0.000000e+00> : vector<16xf32>
    %110 = vector.multi_reduction <add>, %109, %cst_27 [1] : vector<16x32xf32> to vector<16xf32>
    %111 = vector.shape_cast %110 : vector<16xf32> to vector<16x1xf32>
    %cst_28 = arith.constant 3.200000e+01 : f32
    %112 = vector.broadcast %cst_28 : f32 to vector<16x1xf32>
    %113 = arith.divf %111, %112 : vector<16x1xf32>
    %114 = arith.mulf %109, %109 : vector<16x32xf32>
    %cst_29 = arith.constant dense<0.000000e+00> : vector<16xf32>
    %115 = vector.multi_reduction <add>, %114, %cst_29 [1] : vector<16x32xf32> to vector<16xf32>
    %116 = vector.shape_cast %115 : vector<16xf32> to vector<16x1xf32>
    %cst_30 = arith.constant 3.200000e+01 : f32
    %117 = vector.broadcast %cst_30 : f32 to vector<16x1xf32>
    %118 = arith.divf %116, %117 : vector<16x1xf32>
    %119 = arith.mulf %113, %113 : vector<16x1xf32>
    %120 = arith.subf %118, %119 : vector<16x1xf32>
    %cst_31 = arith.constant 9.99999974E-6 : f32
    %121 = vector.broadcast %cst_31 : f32 to vector<16x1xf32>
    %122 = arith.addf %120, %121 : vector<16x1xf32>
    %123 = math.rsqrt %122 : vector<16x1xf32>
    %124 = vector.broadcast %113 : vector<16x1xf32> to vector<16x32xf32>
    %125 = arith.subf %109, %124 : vector<16x32xf32>
    %126 = vector.broadcast %123 : vector<16x1xf32> to vector<16x32xf32>
    %127 = arith.mulf %125, %126 : vector<16x32xf32>
    %128 = vector.broadcast %8 : vector<1x32xf32> to vector<16x32xf32>
    %129 = arith.mulf %127, %128 : vector<16x32xf32>
    %130 = vector.broadcast %9 : vector<1x32xf32> to vector<16x32xf32>
    %131 = arith.addf %129, %130 : vector<16x32xf32>
    %132 = vector.extract_strided_slice %131 {offsets = [0, 0], sizes = [4, 32], strides = [1, 1]} : vector<16x32xf32> to vector<4x32xf32>
    %133 = vector.extract_strided_slice %131 {offsets = [4, 0], sizes = [4, 32], strides = [1, 1]} : vector<16x32xf32> to vector<4x32xf32>
    %134 = vector.extract_strided_slice %131 {offsets = [8, 0], sizes = [4, 32], strides = [1, 1]} : vector<16x32xf32> to vector<4x32xf32>
    %135 = vector.extract_strided_slice %131 {offsets = [12, 0], sizes = [4, 32], strides = [1, 1]} : vector<16x32xf32> to vector<4x32xf32>
    %136 = tpu.concatenate %132, %133, %134, %135 in 1 : vector<4x32xf32>, vector<4x32xf32>, vector<4x32xf32>, vector<4x32xf32> -> vector<4x128xf32>
    %c0_32 = arith.constant 0 : index
    %c0_33 = arith.constant 0 : index
    %137 = vector.load %arg6[%c0_32, %c0_33] : memref<4x128xf32, #tpu.memory_space<vmem>>, vector<4x128xf32>
    tpu.vector_store %arg6[%c0_32, %c0_33], %136 {strides = array<i32>} : memref<4x128xf32, #tpu.memory_space<vmem>>, vector<4x128xf32>,
    return
  }
}

</mosaic_0001>

<bundles_post_ra>
// kernel: tpu_custom_call.1
= control target key start
LH: loop header
LB: loop body
LE: loop exit
PB: predicated region body
PF: predicated region fallthrough
CT: control target
= control target key end

     0   :  { %11 = vsyncpa [#allocation3], 0  ;;  %s2436_s0 = inlined_call_operand.hbm [shape: f32[16,32], index: 0, kind: input, shape index: {}]   ;;  %s2437_s1 = inlined_call_operand.vmem [shape: f32[32,96], index: 1, kind: input, shape index: {}]   ;;  %s2438_s2 = inlined_call_operand.vmem [shape: f32[32,32], index: 2, kind: input, shape index: {}]   ;;  %s2439_s3 = inlined_call_operand.vmem [shape: f32[32,64], index: 3, kind: input, shape index: {}]   ;;  %s2440_s4 = inlined_call_operand.vmem [shape: f32[64,32], index: 4, kind: input, shape index: {}]   ;;  %s2441_s5 = inlined_call_operand.vmem [shape: f32[8,128], index: 5, kind: input, shape index: {}]   ;;  %s2442_s6 = inlined_call_operand.hbm [shape: f32[4,128], index: 6, kind: output, shape index: {}]  }
   0x1   :  { %12 = vsyncpa [#allocation4], 0  ;;  %s2072_s21 = smov [#allocation2]   ;;  %s2024_s25 = scalar_lea.hbm %s2436_s0, 256 }
   0x2   :  { %s18_s22 = sshll.u32 %s2072_s21, 4  ;;  %p2025_p0 = scmp.ne.s32.totalorder %s2436_s0, %s2024_s25  ;;  %s19_s22 = int_to_ptr.vmem [resolvable:$true] %s18_s22 }
   0x3   :  { %p2028_p1 = scmp.lt.u32.totalorder %s2024_s25, %s2436_s0 }
   0x5   :  { %p2030_p2 = pnand %p2028_p1, %p2025_p0 }
   0x7   :  { %2033 = shalt.err (!%p2030_p2)
}
   0x8   :  { %s2034_s30 = scalar_lea.vmem %s19_s22, 256  ;;  %p2039_p4 = scmp.lt.s32.totalorder %s19_s22, %s19_s22 }
   0x9   :  { %p2035_p3 = scmp.ne.s32.totalorder %s19_s22, %s2034_s30  ;;  %p2040_p5 = scmp.lt.s32.totalorder %s2034_s30, %s2034_s30 }
   0xb   :  { %p2041_p6 = por %p2040_p5, %p2039_p4 }
   0xd   :  { %p2042_p7 = pnand %p2041_p6, %p2035_p3 }
   0xf   :  { %2045 = shalt.err (!%p2042_p7)
}
  0x10   :  { %s2073_s7 = smov 128   ;;  %s2074_s8 = smov 8  }
  0x11   :  { %24 = dma.hbm_to_vmem [thread:$0]  %s2436_s0, 256, %s19_s22, [#allocation3], %s2073_s7, %s2073_s7, %s2074_s8  }
  0x12   :  { %2068 = dma.done.wait [#allocation3], 256  }
  0x13   :  { %2069 = vsyncadd [#allocation3], 4294967040  ;;  %v2075_v0 = vmov 0.0   ;;  %vm2076_vm0 = vmmov 0   ;;  %v42_v1 = vld [vmem:[%s2437_s1] sm:$0xff]  ;;  %v43_v2 = vld [vmem:[%s2437_s1 + $0x8] sm:$0xff]  ;;  %v49_v10 = vlaneseq }
  0x14   :  { %1835 = vmatprep.subr.bf16.mxu0 %v2075_v0  ;;  %1839 = vmatprep.mubr.msk.bf16.mxu0 %vm2076_vm0, %v2075_v0  ;;  %v44_v3 = vld [vmem:[%s2437_s1 + $0x10] sm:$0xff]  ;;  %v47_v4 = vpack.c.bf16 %v43_v2, %v42_v1  ;;  %v45_v5 = vld [vmem:[%s2437_s1 + $0x18] sm:$0xff]  ;;  %v2152_v7 = vld [vmem:[#allocation2] sm:$0xff]  ;;  %vm53_vm1 = vcmask 261120   ;;  %s2077_s19 = smov 112   ;;  %s2078_s20 = smov 120  }
  0x15   :  { %1848 = vmatprep.subr.mxu1 %v2075_v0  ;;  %1850 = vmatprep.mubr.msk.f32.mxu1 %vm2076_vm0, %v2075_v0  ;;  %v48_v6 = vpack.c.bf16 %v45_v5, %v44_v3  ;;  %v2154_v8 = vld [vmem:[#allocation2 + $0x8] sm:$0xff]  ;;  %v2163_v11 = vshrl.u32 %v49_v10, 7  ;;  %v2169_v13 = vld [vmem:[%s2441_s5] sm:$0xff]  ;;  %s2079_s5 = smov 104   ;;  %s2080_s21 = smov 96   ;;  %vm114_vm2 = vcmask 64512  }
  0x16   :  { %1836 = vmatpush3.bf16.msra.mxu0 %v47_v4  ;;  %v46_v9 = vpack.c.bf16 %v2154_v8, %v2152_v7  ;;  %s2081_s22 = smov 64   ;;  %s2082_s7 = smov 16   ;;  %vm1443_vm3 = vcmask 130048   ;;  %vm1446_vm4 = vcmask 195584   ;;  %vm1639_vm5 = vcmask 523264  }
  0x17   :  { %1837 = vmatprep.subr.bf16.mxu0 %v2075_v0  ;;  %v51_v12 = vsub.s32 0, %v2163_v11  ;;  %s2085_s30 = smov [#allocation5]   ;;  %vm1743_vm6 = vcmask 785408  }
  0x19   :  { %v52_v14 = vrot.slane %v2169_v13, %v51_v12 }
  0x1a   :  { %1838 = vmatpush3.bf16.msra.mxu0 %v48_v6 }
  0x1b   :  { %1843 = vmatprep.subr.mxu0 %v2075_v0 }
  0x1d   :  { %1840 = vmatmul.mubr.msk.bf16.vlgmr.msra.gmra.mrb[0].mxu0 %vm53_vm1, %v46_v9 }
  0x1e   :  { %1845 = vmatprep.mubr.msk.f32.mxu0 %vm2076_vm0, %v2075_v0 }
  0xf0   :  { %v91_v15 = vpop.f32.mrb[0].mxu0 }
  0xf1   :  { %v2172_v16 = vadd.f32 %v91_v15, %v52_v14  ;;  %v1841_v17 = vpop.f32.mrb[1].mxu0 }
  0xf2   :  { %v94_v18 = vpop.f32.mrb[2].mxu0 }
  0xf3   :  { %104 = vrot.lane.b32.xlu1 %v2172_v16, %s2077_s19  ;;  %100 = vrot.lane.b32.xlu0 %v2172_v16, %s2078_s20  ;;  %v1842_v19 = vpop.f32.mrb[3].mxu0  ;;  %v2176_v20 = vadd.f32 %v94_v18, %v52_v14 }
  0xf7   :  { %106 = vrot.lane.b32.xlu1 %v2176_v20, %s2077_s19  ;;  %102 = vrot.lane.b32.xlu0 %v2176_v20, %s2078_s20 }
  0xfb   :  { %110 = vrot.lane.b32.xlu1 %v2176_v20, %s2079_s5  ;;  %108 = vrot.lane.b32.xlu0 %v2172_v16, %s2079_s5 }
  0xff   :  { %189 = vrot.lane.b32.xlu1 %v2176_v20, %s2080_s21  ;;  %112 = vrot.lane.b32.xlu0 %v2172_v16, %s2080_s21 }
 0x165   :  { %v2186_v21 = vpop.permute.xlu1 %104  ;;  %v2188_v22 = vpop.permute.xlu0 %100 }
 0x166   :  { %265 = vrot.lane.b32.xlu0 %v2188_v22, %s2080_s21 }
 0x169   :  { %v2192_v23 = vpop.permute.xlu1 %106  ;;  %v2194_v24 = vpop.permute.xlu0 %102 }
 0x16a   :  { %417 = vrot.lane.b32.xlu0 %v2186_v21, %s2080_s21  ;;  %341 = vrot.lane.b32.xlu1 %v2194_v24, %s2080_s21 }
 0x16d   :  { %v2200_v25 = vpop.permute.xlu1 %110  ;;  %v2202_v26 = vpop.permute.xlu0 %108 }
 0x16e   :  { %493 = vrot.lane.b32.xlu1 %v2192_v23, %s2080_s21  ;;  %569 = vrot.lane.b32.xlu0 %v2202_v26, %s2080_s21 }
 0x171   :  { %v190_v27 = vpop.permute.xlu1 %189  ;;  %v113_v28 = vpop.permute.xlu0 %112 }
 0x172   :  { %1849 = vmatpush3.xpose.msk.msra.mxu1 %vm114_vm2, %v190_v27  ;;  %645 = vrot.lane.b32.xlu1 %v2200_v25, %s2080_s21 }
 0x173   :  { %1844 = vmatpush3.xpose.msk.msra.mxu0 %vm114_vm2, %v113_v28  ;;  %1853 = vmatprep.subr.mxu1 %v2075_v0 }
 0x174   :  { %1858 = vmatprep.subr.mxu0 %v2075_v0 }
 0x175   :  { %1851 = vmatmul.mubr.msk.f32.vlgmr.msra.gmra.mrb[0].mxu1 %vm114_vm2, %v2176_v20 }
 0x176   :  { %1846 = vmatmul.mubr.msk.f32.vlgmr.msra.gmra.mrb[4].mxu0 %vm114_vm2, %v2172_v16  ;;  %1855 = vmatprep.mubr.msk.f32.mxu1 %vm2076_vm0, %v2075_v0 }
 0x177   :  { %1860 = vmatprep.mubr.msk.f32.mxu0 %vm2076_vm0, %v2075_v0 }
 0x1d8   :  { %v266_v29 = vpop.permute.xlu0 %265 }
 0x1d9   :  { %1854 = vmatpush3.xpose.msk.msra.mxu1 %vm114_vm2, %v266_v29 }
 0x1da   :  { %1863 = vmatprep.subr.mxu1 %v2075_v0 }
 0x1dc   :  { %v342_v30 = vpop.permute.xlu1 %341  ;;  %1856 = vmatmul.mubr.msk.f32.vlgmr.msra.gmra.mrb[2].mxu1 %vm114_vm2, %v2188_v22  ;;  %v418_v31 = vpop.permute.xlu0 %417 }
 0x1dd   :  { %1859 = vmatpush3.xpose.msk.msra.mxu0 %vm114_vm2, %v342_v30  ;;  %1864 = vmatpush3.xpose.msk.msra.mxu1 %vm114_vm2, %v418_v31 }
 0x1de   :  { %1865 = vmatprep.mubr.msk.f32.mxu1 %vm2076_vm0, %v2075_v0  ;;  %1868 = vmatprep.subr.mxu0 %v2075_v0 }
 0x1df   :  { %1873 = vmatprep.subr.mxu1 %v2075_v0 }
 0x1e0   :  { %v494_v32 = vpop.permute.xlu1 %493  ;;  %1861 = vmatmul.mubr.msk.f32.vlgmr.msra.gmra.mrb[6].mxu0 %vm114_vm2, %v2194_v24  ;;  %1866 = vmatmul.mubr.msk.f32.vlgmr.msra.gmra.mrb[4].mxu1 %vm114_vm2, %v2186_v21  ;;  %v570_v33 = vpop.permute.xlu0 %569 }
 0x1e1   :  { %1869 = vmatpush3.xpose.msk.msra.mxu0 %vm114_vm2, %v494_v32  ;;  %1874 = vmatpush3.xpose.msk.msra.mxu1 %vm114_vm2, %v570_v33 }
 0x1e2   :  { %1870 = vmatprep.mubr.msk.f32.mxu0 %vm2076_vm0, %v2075_v0  ;;  %1875 = vmatprep.mubr.msk.f32.mxu1 %vm2076_vm0, %v2075_v0 }
 0x1e3   :  { %1878 = vmatprep.subr.mxu0 %v2075_v0  ;;  %1883 = vmatprep.subr.mxu1 %v2075_v0 }
 0x1e4   :  { %v646_v34 = vpop.permute.xlu1 %645  ;;  %1871 = vmatmul.mubr.msk.f32.vlgmr.msra.gmra.mrb[8].mxu0 %vm114_vm2, %v2192_v23  ;;  %1876 = vmatmul.mubr.msk.f32.vlgmr.msra.gmra.mrb[6].mxu1 %vm114_vm2, %v2202_v26 }
 0x1e5   :  { %1879 = vmatpush3.xpose.msk.msra.mxu0 %vm114_vm2, %v646_v34  ;;  %1880 = vmatprep.mubr.msk.f32.mxu0 %vm2076_vm0, %v2075_v0 }
 0x1e6   :  { %1888 = vmatprep.subr.mxu0 %v2075_v0  ;;  %1885 = vmatprep.mubr.msk.f32.mxu1 %vm2076_vm0, %v2075_v0 }
 0x1e8   :  { %1881 = vmatmul.mubr.msk.f32.vlgmr.msra.gmra.mrb[10].mxu0 %vm114_vm2, %v2200_v25 }
 0x1e9   :  { %1890 = vmatprep.mubr.msk.f32.mxu0 %vm2076_vm0, %v2075_v0 }
 0x248   :  { %v261_v35 = vpop.f32.mrb[0].mxu1 }
 0x249   :  { %v185_v36 = vpop.f32.mrb[4].mxu0  ;;  %v1852_v37 = vpop.f32.mrb[1].mxu1  ;;  %v724_v38 = vsel %vm114_vm2, %v261_v35, -inf }
 0x24a   :  { %v1847_v39 = vpop.f32.mrb[5].mxu0  ;;  %725 = vmax.xlane.f32.xlu1 %v724_v38  ;;  %v721_v40 = vsel %vm114_vm2, %v185_v36, -inf }
 0x24b   :  { %722 = vmax.xlane.f32.xlu0 %v721_v40 }
 0x2af   :  { %v337_v41 = vpop.f32.mrb[2].mxu1 }
 0x2b0   :  { %v1857_v42 = vpop.f32.mrb[3].mxu1  ;;  %v727_v43 = vsel %vm114_vm2, %v337_v41, -inf }
 0x2b1   :  { %728 = vmax.xlane.f32.xlu0 %v727_v43 }
 0x2b3   :  { %v413_v44 = vpop.f32.mrb[6].mxu0  ;;  %v489_v45 = vpop.f32.mrb[4].mxu1 }
 0x2b4   :  { %v1862_v46 = vpop.f32.mrb[7].mxu0  ;;  %v1867_v47 = vpop.f32.mrb[5].mxu1  ;;  %v733_v48 = vsel %vm114_vm2, %v489_v45, -inf  ;;  %v730_v49 = vsel %vm114_vm2, %v413_v44, -inf }
 0x2b5   :  { %734 = vmax.xlane.f32.xlu1 %v733_v48  ;;  %731 = vmax.xlane.f32.xlu0 %v730_v49 }
 0x2b7   :  { %v565_v50 = vpop.f32.mrb[8].mxu0  ;;  %v641_v51 = vpop.f32.mrb[6].mxu1 }
 0x2b8   :  { %v1872_v52 = vpop.f32.mrb[9].mxu0  ;;  %v1877_v53 = vpop.f32.mrb[7].mxu1  ;;  %v739_v54 = vsel %vm114_vm2, %v641_v51, -inf  ;;  %v736_v55 = vsel %vm114_vm2, %v565_v50, -inf }
 0x2b9   :  { %740 = vmax.xlane.f32.xlu1 %v739_v54  ;;  %737 = vmax.xlane.f32.xlu0 %v736_v55 }
 0x2bb   :  { %v717_v56 = vpop.f32.mrb[10].mxu0 }
 0x2bc   :  { %v1882_v57 = vpop.f32.mrb[11].mxu0  ;;  %v742_v58 = vsel %vm114_vm2, %v717_v56, -inf }
 0x2bd   :  { %743 = vmax.xlane.f32.xlu0 %v742_v58 }
 0x2ca   :  { %809 = vrot.lane.b32.xlu1 %v2172_v16, %s2081_s22 }
 0x2ce   :  { %961 = vrot.lane.b32.xlu1 %v2188_v22, %s2081_s22 }
 0x2d2   :  { %1037 = vrot.lane.b32.xlu1 %v2194_v24, %s2081_s22 }
 0x2d3   :  { %885 = vrot.lane.b32.xlu0 %v2176_v20, %s2081_s22 }
 0x2d6   :  { %1189 = vrot.lane.b32.xlu1 %v2192_v23, %s2081_s22 }
 0x2d7   :  { %1113 = vrot.lane.b32.xlu0 %v2186_v21, %s2081_s22  ;;  %v726_v59 = vpop.xlane.xlu1 %725 }
 0x2d8   :  { %v746_v60 = vsub.f32 %v261_v35, %v726_v59  ;;  %v723_v61 = vpop.xlane.xlu0 %722 }
 0x2d9   :  { %v745_v63 = vsub.f32 %v185_v36, %v723_v61 }
 0x2da   :  { %v755_v62 = vmul.f32 1.442695, %v746_v60 }
 0x2db   :  { %v753_v1 = vmul.f32 1.442695, %v745_v63 }
 0x2dc   :  { %1980 = vpow2.f32 %v755_v62 }
 0x2dd   :  { %1982 = vpow2.f32 %v753_v1 }
 0x2e6   :  { %v2278_v2 = vpop.eup %1980 }
 0x2e7   :  { %v772_v3 = vsel %vm114_vm2, %v2278_v2, 0.0  ;;  %v2282_v4 = vpop.eup %1982 }
 0x2e8   :  { %v769_v5 = vsel %vm114_vm2, %v2282_v4, 0.0 }
 0x2f6   :  { %773 = vadd.xlane.f32.xlu0 %v772_v3 }
 0x2fa   :  { %770 = vadd.xlane.f32.xlu1 %v769_v5 }
 0x33e   :  { %v729_v6 = vpop.xlane.xlu0 %728 }
 0x33f   :  { %v747_v9 = vsub.f32 %v337_v41, %v729_v6 }
 0x341   :  { %v757_v10 = vmul.f32 1.442695, %v747_v9 }
 0x342   :  { %v735_v12 = vpop.xlane.xlu1 %734  ;;  %v732_v14 = vpop.xlane.xlu0 %731 }
 0x343   :  { %1984 = vpow2.f32 %v757_v10  ;;  %v749_v15 = vsub.f32 %v489_v45, %v735_v12  ;;  %v748_v16 = vsub.f32 %v413_v44, %v732_v14 }
 0x345   :  { %v761_v17 = vmul.f32 1.442695, %v749_v15  ;;  %v759_v18 = vmul.f32 1.442695, %v748_v16 }
 0x346   :  { %v741_v19 = vpop.xlane.xlu1 %740  ;;  %v738_v20 = vpop.xlane.xlu0 %737 }
 0x347   :  { %1986 = vpow2.f32 %v761_v17  ;;  %v751_v21 = vsub.f32 %v641_v51, %v741_v19  ;;  %v750_v22 = vsub.f32 %v565_v50, %v738_v20  ;;  %v1449_v17 = vld [vmem:[%s2438_s2] sm:$0xff] }
 0x348   :  { %1988 = vpow2.f32 %v759_v18  ;;  %v1450_v18 = vld [vmem:[%s2438_s2 + $0x8] sm:$0xff] }
 0x349   :  { %v765_v23 = vmul.f32 1.442695, %v751_v21  ;;  %v763_v24 = vmul.f32 1.442695, %v750_v22  ;;  %v1454_v20 = vpack.c.bf16 %v1450_v18, %v1449_v17  ;;  %v1451_v22 = vld [vmem:[%s2438_s2 + $0x10] sm:$0xff] }
 0x34a   :  { %v810_v27 = vpop.permute.xlu1 %809  ;;  %v744_v28 = vpop.xlane.xlu0 %743 }
 0x34b   :  { %1990 = vpow2.f32 %v765_v23  ;;  %v752_v29 = vsub.f32 %v717_v56, %v744_v28  ;;  %1884 = vmatpush3.msra.mxu1 %v810_v27  ;;  %v1452_v23 = vld [vmem:[%s2438_s2 + $0x18] sm:$0xff]  ;;  %s2083_s2 = smov 24  }
 0x34c   :  { %1992 = vpow2.f32 %v763_v24  ;;  %1893 = vmatprep.subr.mxu1 %v2075_v0  ;;  %v1455_v27 = vpack.c.bf16 %v1452_v23, %v1451_v22 }
 0x34d   :  { %v1985_v30 = vpop.eup %1984  ;;  %v767_v31 = vmul.f32 1.442695, %v752_v29 }
 0x34e   :  { %v886_v32 = vpop.permute.xlu0 %885  ;;  %v775_v33 = vsel %vm114_vm2, %v1985_v30, 0.0  ;;  %v962_v44 = vpop.permute.xlu1 %961 }
 0x34f   :  { %1994 = vpow2.f32 %v767_v31  ;;  %776 = vadd.xlane.f32.xlu1 %v775_v33  ;;  %1889 = vmatpush3.msra.mxu0 %v886_v32 }
 0x350   :  { %1898 = vmatprep.subr.mxu0 %v2075_v0 }
 0x351   :  { %v1987_v34 = vpop.eup %1986 }
 0x352   :  { %v1989_v35 = vpop.eup %1988  ;;  %v781_v36 = vsel %vm114_vm2, %v1987_v34, 0.0  ;;  %v1038_v45 = vpop.permute.xlu1 %1037 }
 0x353   :  { %782 = vadd.xlane.f32.xlu1 %v781_v36  ;;  %v778_v37 = vsel %vm114_vm2, %v1989_v35, 0.0  ;;  %v1114_v46 = vpop.permute.xlu0 %1113 }
 0x354   :  { %779 = vadd.xlane.f32.xlu0 %v778_v37 }
 0x355   :  { %v1991_v38 = vpop.eup %1990 }
 0x356   :  { %v1993_v39 = vpop.eup %1992  ;;  %v787_v40 = vsel %vm114_vm2, %v1991_v38, 0.0  ;;  %v1190_v47 = vpop.permute.xlu1 %1189 }
 0x357   :  { %788 = vadd.xlane.f32.xlu1 %v787_v40  ;;  %v784_v41 = vsel %vm114_vm2, %v1993_v39, 0.0 }
 0x358   :  { %785 = vadd.xlane.f32.xlu0 %v784_v41 }
 0x359   :  { %v2293_v42 = vpop.eup %1994 }
 0x35a   :  { %v790_v43 = vsel %vm114_vm2, %v2293_v42, 0.0 }
 0x35c   :  { %791 = vadd.xlane.f32.xlu0 %v790_v43 }
 0x368   :  { %1341 = vrot.lane.b32.xlu1 %v2200_v25, %s2081_s22 }
 0x372   :  { %1265 = vrot.lane.b32.xlu0 %v2202_v26, %s2081_s22 }
 0x383   :  { %v774_v48 = vpop.xlane.xlu0 %773 }
 0x384   :  { %1996 = vrcp.f32 %v774_v48 }
 0x387   :  { %v771_v49 = vpop.xlane.xlu1 %770 }
 0x388   :  { %1998 = vrcp.f32 %v771_v49 }
 0x38e   :  { %v1997_v50 = vpop.eup %1996 }
 0x38f   :  { %v802_v51 = vmul.f32 %v1997_v50, %v2278_v2 }
 0x391   :  { %1891 = vmatmul.mubr.msk.f32.vlgmr.msra.gmra.mrb[12].mxu0 %vm114_vm2, %v802_v51 }
 0x392   :  { %v1999_v52 = vpop.eup %1998  ;;  %1899 = vmatpush3.msra.mxu0 %v1038_v45  ;;  %1900 = vmatprep.mubr.msk.f32.mxu0 %vm2076_vm0, %v2075_v0 }
 0x393   :  { %v801_v25 = vmul.f32 %v1999_v52, %v2282_v4  ;;  %1908 = vmatprep.subr.mxu0 %v2075_v0 }
 0x395   :  { %1886 = vmatmul.mubr.msk.f32.vlgmr.msra.gmra.mrb[8].mxu1 %vm114_vm2, %v801_v25 }
 0x396   :  { %1894 = vmatpush3.msra.mxu1 %v962_v44  ;;  %1895 = vmatprep.mubr.msk.f32.mxu1 %vm2076_vm0, %v2075_v0 }
 0x397   :  { %1903 = vmatprep.subr.mxu1 %v2075_v0 }
 0x3dc   :  { %v777_v26 = vpop.xlane.xlu1 %776 }
 0x3dd   :  { %2000 = vrcp.f32 %v777_v26 }
 0x3e0   :  { %v783_v53 = vpop.xlane.xlu1 %782 }
 0x3e1   :  { %2002 = vrcp.f32 %v783_v53  ;;  %v780_v54 = vpop.xlane.xlu0 %779 }
 0x3e2   :  { %2004 = vrcp.f32 %v780_v54  ;;  %v1458_v54 = vsub.s32 1, %v2163_v11 }
 0x3e4   :  { %v789_v55 = vpop.xlane.xlu1 %788 }
 0x3e5   :  { %2006 = vrcp.f32 %v789_v55  ;;  %v786_v56 = vpop.xlane.xlu0 %785  ;;  %v1459_v55 = vrot.slane %v2169_v13, %v1458_v54  ;;  %v1629_v54 = vld [vmem:[%s2440_s4 + $0x38] sm:$0xff] }
 0x3e6   :  { %2008 = vrcp.f32 %v786_v56 }
 0x3e7   :  { %v2001_v57 = vpop.eup %2000 }
 0x3e8   :  { %v803_v58 = vmul.f32 %v2001_v57, %v1985_v30  ;;  %v1342_v6 = vpop.permute.xlu1 %1341 }
 0x3e9   :  { %v792_v59 = vpop.xlane.xlu0 %791 }
 0x3ea   :  { %2010 = vrcp.f32 %v792_v59  ;;  %1896 = vmatmul.mubr.msk.f32.vlgmr.msra.gmra.mrb[10].mxu1 %vm114_vm2, %v803_v58 }
 0x3eb   :  { %v2003_v60 = vpop.eup %2002  ;;  %1904 = vmatpush3.msra.mxu1 %v1114_v46  ;;  %1905 = vmatprep.mubr.msk.f32.mxu1 %vm2076_vm0, %v2075_v0 }
 0x3ec   :  { %v2005_v61 = vpop.eup %2004  ;;  %v805_v62 = vmul.f32 %v2003_v60, %v1987_v34  ;;  %1913 = vmatprep.subr.mxu1 %v2075_v0 }
 0x3ed   :  { %v804_v63 = vmul.f32 %v2005_v61, %v1989_v35  ;;  %v1266_v1 = vpop.permute.xlu0 %1265 }
 0x3ee   :  { %1906 = vmatmul.mubr.msk.f32.vlgmr.msra.gmra.mrb[12].mxu1 %vm114_vm2, %v805_v62 }
 0x3ef   :  { %v2007_v2 = vpop.eup %2006  ;;  %1901 = vmatmul.mubr.msk.f32.vlgmr.msra.gmra.mrb[14].mxu0 %vm114_vm2, %v804_v63  ;;  %1914 = vmatpush3.msra.mxu1 %v1266_v1 }
 0x3f0   :  { %v2009_v3 = vpop.eup %2008  ;;  %v807_v4 = vmul.f32 %v2007_v2, %v1991_v38  ;;  %1909 = vmatpush3.msra.mxu0 %v1190_v47  ;;  %1910 = vmatprep.mubr.msk.f32.mxu0 %vm2076_vm0, %v2075_v0 }
 0x3f1   :  { %v806_v5 = vmul.f32 %v2009_v3, %v1993_v39  ;;  %1915 = vmatprep.mubr.msk.f32.mxu1 %vm2076_vm0, %v2075_v0  ;;  %1918 = vmatprep.subr.mxu0 %v2075_v0 }
 0x3f2   :  { %1916 = vmatmul.mubr.msk.f32.vlgmr.msra.gmra.mrb[14].mxu1 %vm114_vm2, %v807_v4  ;;  %1923 = vmatprep.subr.bf16.mxu1 %v2075_v0 }
 0x3f3   :  { %1911 = vmatmul.mubr.msk.f32.vlgmr.msra.gmra.mrb[16].mxu0 %vm114_vm2, %v806_v5  ;;  %1927 = vmatprep.mubr.msk.bf16.mxu1 %vm2076_vm0, %v2075_v0 }
 0x3f4   :  { %v2011_v9 = vpop.eup %2010  ;;  %1919 = vmatpush3.msra.mxu0 %v1342_v6  ;;  %1920 = vmatprep.mubr.msk.f32.mxu0 %vm2076_vm0, %v2075_v0 }
 0x3f5   :  { %v808_v10 = vmul.f32 %v2011_v9, %v2293_v42  ;;  %1931 = vmatprep.subr.bf16.mxu0 %v2075_v0  ;;  %1924 = vmatpush3.bf16.msra.mxu1 %v1454_v20 }
 0x3f6   :  { %1925 = vmatprep.subr.bf16.mxu1 %v2075_v0 }
 0x3f7   :  { %1921 = vmatmul.mubr.msk.f32.vlgmr.msra.gmra.mrb[18].mxu0 %vm114_vm2, %v808_v10  ;;  %v1551_v10 = vld [vmem:[%s2439_s3 + $0x10] sm:$0xff] }
 0x3f8   :  { %1935 = vmatprep.mubr.msk.bf16.mxu0 %vm2076_vm0, %v2075_v0 }
 0x3f9   :  { %1926 = vmatpush3.bf16.msra.mxu1 %v1455_v27 }
 0x3fa   :  { %1939 = vmatprep.subr.bf16.mxu1 %v2075_v0 }
 0x464   :  { %v957_v12 = vpop.f32.mrb[12].mxu0 }
 0x465   :  { %v1892_v14 = vpop.f32.mrb[13].mxu0 }
 0x468   :  { %v881_v15 = vpop.f32.mrb[8].mxu1 }
 0x469   :  { %v1887_v16 = vpop.f32.mrb[9].mxu1 }
 0x4bd   :  { %v1033_v19 = vpop.f32.mrb[10].mxu1 }
 0x4be   :  { %v1897_v21 = vpop.f32.mrb[11].mxu1 }
 0x4c1   :  { %v1185_v24 = vpop.f32.mrb[12].mxu1 }
 0x4c2   :  { %v1109_v28 = vpop.f32.mrb[14].mxu0  ;;  %v1907_v29 = vpop.f32.mrb[13].mxu1 }
 0x4c3   :  { %v1965_v30 = vpack.i.bf16 %v1109_v28, %v1033_v19  ;;  %v1902_v31 = vpop.f32.mrb[15].mxu0 }
 0x4c4   :  { %v1539_v31 = vsub.s32 2, %v2163_v11 }
 0x4c5   :  { %1966 = vrot.lane.b32.xlu0 %v1965_v30, %s2074_s8  ;;  %v1337_v32 = vpop.f32.mrb[14].mxu1 }
 0x4c6   :  { %v1261_v33 = vpop.f32.mrb[16].mxu0  ;;  %v1917_v34 = vpop.f32.mrb[15].mxu1 }
 0x4c7   :  { %v1970_v35 = vpack.i.bf16 %v1261_v33, %v1185_v24  ;;  %v1912_v36 = vpop.f32.mrb[17].mxu0  ;;  %v1540_v33 = vrot.slane %v2169_v13, %v1539_v31  ;;  %v1545_v34 = vsub.s32 3, %v2163_v11 }
 0x4c9   :  { %1971 = vrot.lane.b32.xlu1 %v1970_v35, %s2082_s7  ;;  %s1752_s7 = sshll.u32 %s2085_s30, 4  ;;  %s1753_s7 = int_to_ptr.vmem [resolvable:$true] %s1752_s7 }
 0x4ca   :  { %v1413_v37 = vpop.f32.mrb[18].mxu0  ;;  %p2051_p9 = scmp.lt.s32.totalorder %s1753_s7, %s1753_s7 }
 0x4cb   :  { %v1975_v38 = vpack.i.bf16 %v1413_v37, %v1337_v32  ;;  %v1922_v39 = vpop.f32.mrb[19].mxu0 }
 0x4cd   :  { %1976 = vrot.lane.b32.xlu0 %v1975_v38, %s2083_s2  ;;  %s2046_s2 = scalar_lea.vmem %s1753_s7, 64 }
 0x4ce   :  { %p2047_p8 = scmp.ne.s32.totalorder %s1753_s7, %s2046_s2  ;;  %p2052_p10 = scmp.lt.s32.totalorder %s2046_s2, %s2046_s2 }
 0x4d0   :  { %p2053_p11 = por %p2052_p10, %p2051_p9 }
 0x4d2   :  { %p2054_p12 = pnand %p2053_p11, %p2047_p8 }
 0x537   :  { %v1967_v40 = vpop.permute.xlu0 %1966 }
 0x538   :  { %v1969_v42 = vunpack.i.h.bf16 %v1967_v40  ;;  %v1968_v43 = vunpack.i.l.bf16 %v1967_v40 }
 0x53a   :  { %v1442_v47 = vsel %vm114_vm2, %v957_v12, %v1969_v42  ;;  %v1441_v48 = vsel %vm114_vm2, %v881_v15, %v1968_v43  ;;  %v1552_v12 = vld [vmem:[%s2439_s3 + $0x18] sm:$0xff] }
 0x53b   :  { %v1972_v41 = vpop.permute.xlu1 %1971  ;;  %v1555_v14 = vpack.c.bf16 %v1552_v12, %v1551_v10 }
 0x53c   :  { %v1974_v44 = vunpack.i.h.bf16 %v1972_v41  ;;  %v1973_v45 = vunpack.i.l.bf16 %v1972_v41  ;;  %v1546_v41 = vrot.slane %v2169_v13, %v1545_v34 }
 0x53e   :  { %v1445_v51 = vsel %vm1443_vm3, %v1442_v47, %v1974_v44  ;;  %v1444_v52 = vsel %vm1443_vm3, %v1441_v48, %v1973_v45  ;;  %v1623_v47 = vld [vmem:[%s2440_s4 + $0x8] sm:$0xff]  ;;  %v1624_v48 = vld [vmem:[%s2440_s4 + $0x10] sm:$0xff] }
 0x53f   :  { %v1977_v46 = vpop.permute.xlu0 %1976 }
 0x540   :  { %v1979_v49 = vunpack.i.h.bf16 %v1977_v46  ;;  %v1978_v50 = vunpack.i.l.bf16 %v1977_v46  ;;  %v1622_v46 = vld [vmem:[%s2440_s4] sm:$0xff] }
 0x542   :  { %v1448_v25 = vsel %vm1446_vm4, %v1445_v51, %v1979_v49  ;;  %v1447_v26 = vsel %vm1446_vm4, %v1444_v52, %v1978_v50  ;;  %v1631_v49 = vpack.c.bf16 %v1623_v47, %v1622_v46  ;;  %v1625_v50 = vld [vmem:[%s2440_s4 + $0x18] sm:$0xff]  ;;  %v1626_v52 = vld [vmem:[%s2440_s4 + $0x20] sm:$0xff] }
 0x543   :  { %v1453_v53 = vpack.c.bf16 %v1448_v25, %v1447_v26  ;;  %v1632_v51 = vpack.c.bf16 %v1625_v50, %v1624_v48  ;;  %v1627_v25 = vld [vmem:[%s2440_s4 + $0x28] sm:$0xff] }
 0x544   :  { %v1633_v26 = vpack.c.bf16 %v1627_v25, %v1626_v52  ;;  %v1718_v25 = vsub.s32 6, %v2163_v11 }
 0x545   :  { %1928 = vmatmul.mubr.msk.bf16.vlgmr.msra.gmra.mrb[16].mxu1 %vm53_vm1, %v1453_v53  ;;  %v1628_v53 = vld [vmem:[%s2440_s4 + $0x30] sm:$0xff]  ;;  %s2084_s4 = smov 32  }
 0x546   :  { %1947 = vmatprep.mubr.msk.bf16.mxu1 %vm2076_vm0, %v2075_v0  ;;  %1940 = vmatpush3.bf16.msra.mxu1 %v1631_v49 }
 0x547   :  { %1941 = vmatprep.subr.bf16.mxu1 %v2075_v0 }
 0x54a   :  { %1942 = vmatpush3.bf16.msra.mxu1 %v1632_v51 }
 0x54b   :  { %1943 = vmatprep.subr.bf16.mxu1 %v2075_v0 }
 0x54e   :  { %1944 = vmatpush3.bf16.msra.mxu1 %v1633_v26  ;;  %v1724_v26 = vsub.s32 7, %v2163_v11 }
 0x54f   :  { %1945 = vmatprep.subr.bf16.mxu1 %v2075_v0 }
 0x618   :  { %v1497_v56 = vpop.f32.mrb[16].mxu1 }
 0x619   :  { %v1498_v57 = vadd.f32 %v1497_v56, %v1459_v55  ;;  %v1929_v58 = vpop.f32.mrb[17].mxu1  ;;  %v1558_v56 = vsub.s32 4, %v2163_v11 }
 0x61a   :  { %v1500_v59 = vpop.f32.mrb[18].mxu1 }
 0x61b   :  { %v1504_v60 = vadd.f32 %v1498_v57, %v2152_v7  ;;  %v1501_v61 = vadd.f32 %v1500_v59, %v1459_v55  ;;  %v1930_v62 = vpop.f32.mrb[19].mxu1  ;;  %v1549_v7 = vld [vmem:[%s2439_s3] sm:$0xff]  ;;  %v1634_v55 = vpack.c.bf16 %v1629_v54, %v1628_v53  ;;  %v1559_v57 = vrot.slane %v2169_v13, %v1558_v56 }
 0x61c   :  { %v1719_v54 = vrot.slane %v2169_v13, %v1718_v25 }
 0x61d   :  { %v1505_v63 = vadd.f32 %v1501_v61, %v2154_v8  ;;  %v1506_v1 = vsel %vm53_vm1, %v1504_v60, 0.0  ;;  %v1515_v4 = vmul.f32 %v1504_v60, %v1504_v60  ;;  %v1550_v8 = vld [vmem:[%s2439_s3 + $0x8] sm:$0xff]  ;;  %1946 = vmatpush3.bf16.msra.mxu1 %v1634_v55 }
 0x61e   :  { %1507 = vadd.xlane.f32.xlu1 %v1506_v1  ;;  %v1554_v9 = vpack.c.bf16 %v1550_v8, %v1549_v7 }
 0x61f   :  { %v1509_v2 = vsel %vm53_vm1, %v1505_v63, 0.0  ;;  %v1516_v3 = vmul.f32 %v1505_v63, %v1505_v63  ;;  %v1517_v6 = vsel %vm53_vm1, %v1515_v4, 0.0 }
 0x620   :  { %1510 = vadd.xlane.f32.xlu0 %v1509_v2  ;;  %1932 = vmatpush3.bf16.msra.mxu0 %v1554_v9 }
 0x621   :  { %v1520_v5 = vsel %vm53_vm1, %v1516_v3, 0.0  ;;  %1933 = vmatprep.subr.bf16.mxu0 %v2075_v0 }
 0x622   :  { %1521 = vadd.xlane.f32.xlu1 %v1520_v5 }
 0x624   :  { %1518 = vadd.xlane.f32.xlu0 %v1517_v6  ;;  %1934 = vmatpush3.bf16.msra.mxu0 %v1555_v14 }
 0x6ab   :  { %v1508_v15 = vpop.xlane.xlu1 %1507 }
 0x6ac   :  { %v1513_v17 = vmul.f32 0.03125, %v1508_v15 }
 0x6ad   :  { %v1511_v16 = vpop.xlane.xlu0 %1510 }
 0x6ae   :  { %v1514_v18 = vmul.f32 0.03125, %v1511_v16  ;;  %v1525_v23 = vmul.f32 %v1513_v17, %v1513_v17  ;;  %v1533_v36 = vsub.f32 %v1504_v60, %v1513_v17 }
 0x6af   :  { %v1522_v19 = vpop.xlane.xlu1 %1521 }
 0x6b0   :  { %v1526_v20 = vmul.f32 %v1514_v18, %v1514_v18  ;;  %v1524_v21 = vmul.f32 0.03125, %v1522_v19  ;;  %v1534_v32 = vsub.f32 %v1505_v63, %v1514_v18 }
 0x6b1   :  { %v1519_v22 = vpop.xlane.xlu0 %1518 }
 0x6b2   :  { %v1528_v24 = vsub.f32 %v1524_v21, %v1526_v20  ;;  %v1523_v27 = vmul.f32 0.03125, %v1519_v22  ;;  %v1637_v21 = vsub.s32 5, %v2163_v11 }
 0x6b4   :  { %v1530_v28 = vadd.f32 1e-05, %v1528_v24  ;;  %v1527_v29 = vsub.f32 %v1523_v27, %v1525_v23  ;;  %v1638_v22 = vrot.slane %v2169_v13, %v1637_v21 }
 0x6b6   :  { %2012 = vrsqrt.f32 %v1530_v28  ;;  %v1529_v30 = vadd.f32 1e-05, %v1527_v29 }
 0x6b8   :  { %2014 = vrsqrt.f32 %v1529_v30 }
 0x6c0   :  { %v2013_v35 = vpop.eup %2012 }
 0x6c1   :  { %v1536_v37 = vmul.f32 %v2013_v35, %v1534_v32 }
 0x6c2   :  { %v2015_v38 = vpop.eup %2014 }
 0x6c3   :  { %v1535_v39 = vmul.f32 %v2015_v38, %v1533_v36  ;;  %v1542_v40 = vmul.f32 %v1540_v33, %v1536_v37 }
 0x6c5   :  { %v1541_v42 = vmul.f32 %v1540_v33, %v1535_v39  ;;  %v1548_v44 = vadd.f32 %v1546_v41, %v1542_v40 }
 0x6c7   :  { %v1547_v43 = vadd.f32 %v1546_v41, %v1541_v42 }
 0x6c9   :  { %v1553_v45 = vpack.c.bf16 %v1548_v44, %v1547_v43 }
 0x6cb   :  { %1936 = vmatmul.mubr.msk.bf16.vlgmr.msra.gmra.mrb[20].mxu0 %vm53_vm1, %v1553_v45 }
 0x79e   :  { %v1597_v58 = vpop.f32.mrb[20].mxu0 }
 0x79f   :  { %v1598_v59 = vadd.f32 %v1597_v58, %v1559_v57  ;;  %v1937_v60 = vpop.f32.mrb[21].mxu0  ;;  %v1725_v58 = vrot.slane %v2169_v13, %v1724_v26 }
 0x7a0   :  { %v1600_v61 = vpop.f32.mrb[22].mxu0 }
 0x7a1   :  { %v1606_v62 = vmul.f32 0.044715, %v1598_v59  ;;  %v1601_v63 = vadd.f32 %v1600_v61, %v1559_v57  ;;  %v1938_v1 = vpop.f32.mrb[23].mxu0  ;;  %v1604_v15 = vmul.f32 0.5, %v1598_v59 }
 0x7a3   :  { %v1608_v2 = vmul.f32 %v1606_v62, %v1598_v59  ;;  %v1607_v3 = vmul.f32 0.044715, %v1601_v63  ;;  %v1605_v16 = vmul.f32 0.5, %v1601_v63 }
 0x7a5   :  { %v1610_v4 = vmul.f32 %v1608_v2, %v1598_v59  ;;  %v1609_v5 = vmul.f32 %v1607_v3, %v1601_v63 }
 0x7a7   :  { %v1612_v6 = vadd.f32 %v1610_v4, %v1598_v59  ;;  %v1611_v7 = vmul.f32 %v1609_v5, %v1601_v63 }
 0x7a9   :  { %v1614_v8 = vmul.f32 0.7978846, %v1612_v6  ;;  %v1613_v0 = vadd.f32 %v1611_v7, %v1601_v63 }
 0x7ab   :  { %2016 = vtanh.f32 %v1614_v8  ;;  %v1615_v9 = vmul.f32 0.7978846, %v1613_v0 }
 0x7ad   :  { %2018 = vtanh.f32 %v1615_v9 }
 0x7b5   :  { %v2017_v10 = vpop.eup %2016 }
 0x7b6   :  { %v1618_v12 = vadd.f32 1.0, %v2017_v10 }
 0x7b7   :  { %v2019_v14 = vpop.eup %2018 }
 0x7b8   :  { %v1619_v17 = vadd.f32 1.0, %v2019_v14  ;;  %v1620_v18 = vmul.f32 %v1618_v12, %v1604_v15 }
 0x7ba   :  { %v1621_v19 = vmul.f32 %v1619_v17, %v1605_v16 }
 0x7bc   :  { %v1630_v20 = vpack.c.bf16 %v1621_v19, %v1620_v18 }
 0x7be   :  { %1948 = vmatmul.mubr.msk.bf16.vlgmr.msra.gmra.mrb[20].mxu1 %vm1639_vm5, %v1630_v20 }
 0x891   :  { %v1677_v23 = vpop.f32.mrb[20].mxu1 }
 0x892   :  { %v1678_v24 = vadd.f32 %v1677_v23, %v1638_v22  ;;  %v1949_v27 = vpop.f32.mrb[21].mxu1 }
 0x893   :  { %v1680_v28 = vpop.f32.mrb[22].mxu1 }
 0x894   :  { %v1684_v29 = vadd.f32 %v1678_v24, %v1547_v43  ;;  %v1681_v30 = vadd.f32 %v1680_v28, %v1638_v22  ;;  %v1950_v31 = vpop.f32.mrb[23].mxu1 }
 0x896   :  { %v1685_v32 = vadd.f32 %v1681_v30, %v1548_v44  ;;  %v1686_v33 = vsel %vm53_vm1, %v1684_v29, 0.0  ;;  %v1694_v34 = vmul.f32 %v1684_v29, %v1684_v29 }
 0x897   :  { %1687 = vadd.xlane.f32.xlu0 %v1686_v33 }
 0x898   :  { %v1689_v35 = vsel %vm53_vm1, %v1685_v32, 0.0  ;;  %v1695_v36 = vmul.f32 %v1685_v32, %v1685_v32  ;;  %v1696_v37 = vsel %vm53_vm1, %v1694_v34, 0.0 }
 0x899   :  { %1690 = vadd.xlane.f32.xlu1 %v1689_v35 }
 0x89a   :  { %v1699_v38 = vsel %vm53_vm1, %v1695_v36, 0.0 }
 0x89b   :  { %1697 = vadd.xlane.f32.xlu0 %v1696_v37 }
 0x89d   :  { %1700 = vadd.xlane.f32.xlu1 %v1699_v38 }
 0x924   :  { %v1688_v39 = vpop.xlane.xlu0 %1687 }
 0x925   :  { %v1692_v40 = vmul.f32 0.03125, %v1688_v39 }
 0x926   :  { %v1691_v41 = vpop.xlane.xlu1 %1690 }
 0x927   :  { %v1693_v42 = vmul.f32 0.03125, %v1691_v41  ;;  %v1704_v44 = vmul.f32 %v1692_v40, %v1692_v40  ;;  %v1712_v53 = vsub.f32 %v1684_v29, %v1692_v40 }
 0x928   :  { %v1698_v43 = vpop.xlane.xlu0 %1697 }
 0x929   :  { %v1702_v45 = vmul.f32 0.03125, %v1698_v43  ;;  %v1705_v47 = vmul.f32 %v1693_v42, %v1693_v42  ;;  %v1713_v56 = vsub.f32 %v1685_v32, %v1693_v42 }
 0x92a   :  { %v1701_v46 = vpop.xlane.xlu1 %1700 }
 0x92b   :  { %v1706_v48 = vsub.f32 %v1702_v45, %v1704_v44  ;;  %v1703_v49 = vmul.f32 0.03125, %v1701_v46 }
 0x92d   :  { %v1708_v50 = vadd.f32 1e-05, %v1706_v48  ;;  %v1707_v51 = vsub.f32 %v1703_v49, %v1705_v47 }
 0x92f   :  { %2020 = vrsqrt.f32 %v1708_v50  ;;  %v1709_v52 = vadd.f32 1e-05, %v1707_v51 }
 0x931   :  { %2022 = vrsqrt.f32 %v1709_v52 }
 0x939   :  { %v2021_v55 = vpop.eup %2020 }
 0x93a   :  { %v1714_v57 = vmul.f32 %v2021_v55, %v1712_v53 }
 0x93b   :  { %v2023_v59 = vpop.eup %2022 }
 0x93c   :  { %v1720_v60 = vmul.f32 %v1719_v54, %v1714_v57  ;;  %v1715_v61 = vmul.f32 %v2023_v59, %v1713_v56 }
 0x93e   :  { %v1726_v62 = vadd.f32 %v1725_v58, %v1720_v60  ;;  %v1721_v63 = vmul.f32 %v1719_v54, %v1715_v61 }
 0x940   :  { %v1729_v1 = vrot.slane %v1726_v62, 4  ;;  %v1727_v2 = vadd.f32 %v1725_v58, %v1721_v63 }
 0x942   :  { %1730 = vrot.lane.b32.xlu0 %v1729_v1, %s2084_s4  ;;  %1734 = vrot.lane.b32.xlu1 %v1727_v2, %s2081_s22  ;;  %v1737_v11 = vrot.slane %v1727_v2, 4 }
 0x946   :  { %1738 = vrot.lane.b32.xlu1 %v1737_v11, %s2080_s21 }
 0x9b4   :  { %v1731_v3 = vpop.permute.xlu0 %1730  ;;  %v1735_v4 = vpop.permute.xlu1 %1734 }
 0x9b5   :  { %v1741_v5 = vsel %vm53_vm1, %v1726_v62, %v1731_v3 }
 0x9b6   :  { %v1742_v13 = vsel %vm1639_vm5, %v1741_v5, %v1735_v4 }
 0x9b8   :  { %v1739_v6 = vpop.permute.xlu1 %1738 }
 0x9b9   :  { %v1744_v7 = vsel %vm1743_vm6, %v1742_v13, %v1739_v6 }
 0x9ba   :  { %1745 = vst [vmem:[#allocation5] sm:$0xf] %v1744_v7 }
 0x9bb   :  { %2057 = shalt.err (!%p2054_p12)
}
 0x9bc   :  { %s2058_s8 = scalar_lea.hbm %s2442_s6, 64 }
 0x9bd   :  { %p2059_p13 = scmp.ne.s32.totalorder %s2442_s6, %s2058_s8  ;;  %p2062_p0 = scmp.lt.u32.totalorder %s2058_s8, %s2442_s6 }
 0x9bf   :  { %p2064_p1 = pnand %p2062_p0, %p2059_p13 }
 0x9c1   :  { %2067 = shalt.err (!%p2064_p1)
}
 0x9c2   :  { %1755 = dma.vmem_to_hbm [thread:$0]  %s1753_s7, 64, %s2442_s6, [#allocation4]  }
 0x9c3   :  { %2070 = dma.done.wait [#allocation4], 64  }
 0x9c4   :  { %2071 = vsyncadd [#allocation4], 4294967232 }
 0x9c5   :  { %1759 = vsyncpa [#allocation3], 1 }
 0x9c6   :  { %1760 = vsyncpa [#allocation4], 1 }

</bundles_post_ra>
